<compile_context>
chip_gen: v6e
topology: v6e:2x2x1
jax: 0.10.0
libtpu: 0.0.40
codegen_flags: <defaults>
</compile_context>

<pallas_src>
import functools

import jax
import jax.numpy as jnp
from jax.experimental import pallas as pl
from jax.experimental.pallas import tpu as pltpu

_LANE = 128
_SUBLANE = 8


def _round_up(v, m):
    return ((v + m - 1) // m) * m


def _tiled_bytes(shape, dtype):
    """Physical VMEM bytes of a 2-D block after (8, 128) tiling."""
    r = _round_up(int(shape[-2]), _SUBLANE)
    c = _round_up(int(shape[-1]), _LANE)
    return r * c * jnp.dtype(dtype).itemsize


def _nfm_kernel(num_layers, residual_flags, n_attr, emb_dim, h0_pad, hidden_dim,
                x_ref, *refs):
    """refs = (w0, b0, w1, b1, ..., w_{L-1}, b_{L-1}, out_ref).

    x_ref  : (TB, n_attr*emb_dim)  flattened, lane-dense tile
    w_l    : (in_pad_l, out_pad_l) zero-padded to lane multiples
    b_l    : (1, out_pad_l)        f32
    out_ref: (TB, hidden_dim)      unpadded (masked store if hidden < 128)
    """
    out_ref = refs[-1]
    param_refs = refs[:-1]
    tb = x_ref.shape[0]

    # ---- Bi-interaction pooling: sum_{i<j} x_i*x_j = 0.5*((sum x)^2 - sum x^2)
    # One dense load; per-attribute access is a static lane slice of the value.
    x_all = x_ref[...].astype(jnp.float32)               # (TB, N*D)
    s = jnp.zeros((tb, emb_dim), jnp.float32)
    sq = jnp.zeros((tb, emb_dim), jnp.float32)
    for i in range(n_attr):                               # n_attr small & static
        xi = x_all[:, i * emb_dim:(i + 1) * emb_dim]
        s = s + xi
        sq = sq + xi * xi
    h = 0.5 * (s * s - sq)                                # (TB, emb_dim)

    # Hoisted (once, not per layer): only needed when layer 0 has a residual
    # and emb_dim is not a lane multiple.  Python-static condition.
    if h0_pad > emb_dim:
        h = jnp.concatenate(
            [h, jnp.zeros((tb, h0_pad - emb_dim), jnp.float32)], axis=1)

    # ---- MLP: MXU matmuls on lane-dense (zero-padded) activations ----
    for layer in range(num_layers):
        w = param_refs[2 * layer][...]                    # (in_pad, out_pad)
        b = param_refs[2 * layer + 1][...]                # (1, out_pad) f32
        z = jnp.dot(h.astype(w.dtype), w, preferred_element_type=jnp.float32)
        z = jnp.maximum(z + b, 0.0)                       # ReLU; dropout=0 -> no-op
        if residual_flags[layer]:                         # logical in==out => widths match
            h = h + z
        else:
            h = z

    # Store only the logical hidden columns: no padded writeback, no post-slice.
    out_ref[...] = h[:, :hidden_dim].astype(out_ref.dtype)


def nfm_forward(x, weights, biases, *, residual_connections=True,
                batch_tile=None, use_bf16=False):
    """x: (B, N, D); weights[l]: (in, out); biases[l]: (out,) or (1, out)."""
    num_layers = len(weights)
    batch, n_attr, emb_dim = map(int, x.shape)
    hidden_dim = int(weights[-1].shape[1])
    nd = n_attr * emb_dim

    # Residual applies whenever a layer's *logical* in/out dims match.
    residual_flags = []
    in_dim = emb_dim
    for w in weights:
        residual_flags.append(bool(residual_connections) and in_dim == int(w.shape[1]))
        in_dim = int(w.shape[1])
    residual_flags = tuple(residual_flags)

    compute_dtype = jnp.bfloat16 if use_bf16 else x.dtype

    # Flatten x to (B, N*D): free reshape, dense HBM->VMEM DMA.
    x_flat = jnp.reshape(x, (batch, nd)).astype(compute_dtype)

    # Layer padding plan: each layer's output padded to a lane multiple; padded
    # W/b entries are zero so they stay exactly zero through bias/ReLU/residual.
    out_pads = [_round_up(int(w.shape[1]), _LANE) for w in weights]
    h0_pad = out_pads[0] if (residual_flags[0] and emb_dim < out_pads[0]) else emb_dim
    in_pads = [h0_pad] + out_pads[:-1]

    params = []
    for w, b, ip, op in zip(weights, biases, in_pads, out_pads):
        in_d, out_d = int(w.shape[0]), int(w.shape[1])
        w_p = jnp.zeros((ip, op), compute_dtype).at[:in_d, :out_d].set(
            w.astype(compute_dtype))
        b_p = jnp.zeros((1, op), jnp.float32).at[:, :out_d].set(
            jnp.reshape(b, (1, -1)).astype(jnp.float32))
        params += [w_p, b_p]

    # ---- batch-tile sizing with physically-tiled (8,128) byte accounting ----
    x_row = _round_up(nd, _LANE) * jnp.dtype(compute_dtype).itemsize
    out_row = _round_up(hidden_dim, _LANE) * jnp.dtype(x.dtype).itemsize
    max_pad = max([h0_pad] + out_pads)
    # fp32 in-kernel temporaries per row: x cast, s, sq, h (+pad), z.
    tmp_row = 4 * (_round_up(nd, _LANE) + 2 * _round_up(emb_dim, _LANE)
                   + _round_up(h0_pad, _LANE) + 2 * max_pad)
    params_bytes = 2 * sum(_tiled_bytes(p.shape, p.dtype) for p in params)  # dbl-buffered
    per_row = 2 * x_row + 2 * out_row + tmp_row           # double-buffered I/O tiles
    budget = 24 << 20                                      # fits v7x (64 MiB VMEM)
    tb_vmem = max(_SUBLANE, (budget - params_bytes) // per_row)

    if batch_tile is None:
        if batch <= _SUBLANE:
            tb = batch                                     # block dim == full array dim
        else:
            # >=2 grid steps (megacore + pipeline overlap), prefer ~512-row tiles.
            n_steps = max(2, pl.cdiv(batch, 512))
            tb_split = _round_up(pl.cdiv(batch, n_steps), _SUBLANE)
            tb = max(_SUBLANE,
                     min((int(tb_vmem) // _SUBLANE) * _SUBLANE, tb_split))
    else:
        tb = int(batch_tile)
    tb = int(min(tb, _round_up(batch, _SUBLANE)))

    vmem_need = tb * per_row + params_bytes
    vmem_limit = int(min(64 << 20, max(vmem_need + (4 << 20), 32 << 20)))

    kernel = functools.partial(_nfm_kernel, num_layers, residual_flags,
                               n_attr, emb_dim, h0_pad, hidden_dim)

    grid = (pl.cdiv(batch, tb),)
    in_specs = [pl.BlockSpec((tb, nd), lambda i: (i, 0))]
    # Params: constant index maps -> fetched once, VMEM-resident across steps.
    in_specs += [pl.BlockSpec(p.shape, lambda i: (0, 0)) for p in params]
    out_specs = pl.BlockSpec((tb, hidden_dim), lambda i: (i, 0))

    out = pl.pallas_call(
        kernel,
        out_shape=jax.ShapeDtypeStruct((batch, hidden_dim), x.dtype),
        grid_spec=pltpu.PrefetchScalarGridSpec(
            num_scalar_prefetch=0,
            grid=grid,
            in_specs=in_specs,
            out_specs=out_specs,
        ),
        compiler_params=pltpu.CompilerParams(
            dimension_semantics=("parallel",),
            vmem_limit_bytes=vmem_limit,
        ),
    )(x_flat, *params)
    return out


def _reference(x, weights, biases, residual=True):
    """Pure-JAX reference of the same forward pass (unpadded params)."""
    s = jnp.sum(x, axis=1)
    sq = jnp.sum(x * x, axis=1)
    h = 0.5 * (s * s - sq)
    for w, b in zip(weights, biases):
        z = jnp.maximum(h @ w + jnp.reshape(b, (1, -1)), 0.0)
        h = h + z if (residual and z.shape == h.shape) else z
    return h


if __name__ == "__main__":
    # Small shapes consistent with the module's forward:
    #   batch=2, n_attributes=4, embedding_dim=32, hidden_dim=16, num_layers=2
    batch, n_attr, emb_dim, hid_dim, num_layers = 2, 4, 32, 16, 2

    key = jax.random.PRNGKey(0)
    kx, kx2, *kws = jax.random.split(key, 2 + 2 * num_layers)

    x = jax.random.normal(kx, (batch, n_attr, emb_dim), dtype=jnp.float32)

    # Deterministic parameter init (uniform, PyTorch-Linear-style fan_in scaling).
    weights, biases = [], []
    in_dim = emb_dim
    for layer in range(num_layers):
        bound = 1.0 / (in_dim ** 0.5)
        w = jax.random.uniform(kws[2 * layer], (in_dim, hid_dim),
                               minval=-bound, maxval=bound, dtype=jnp.float32)
        b = jax.random.uniform(kws[2 * layer + 1], (1, hid_dim),
                               minval=-bound, maxval=bound, dtype=jnp.float32)
        weights.append(w)
        biases.append(b)
        in_dim = hid_dim

    # Single-tile path (batch <= 8).
    out = nfm_forward(x, weights, biases, residual_connections=True)
    out = jax.block_until_ready(out)
    ref = _reference(x, weights, biases, residual=True)
    assert out.shape == (batch, hid_dim), out.shape
    assert jnp.allclose(out, ref, atol=1e-5, rtol=1e-5), \
        f"max abs err {jnp.max(jnp.abs(out - ref))}"

    # Multi-step grid path (>= 2 batch tiles).
    x2 = jax.random.normal(kx2, (32, n_attr, emb_dim), dtype=jnp.float32)
    out2 = jax.block_until_ready(
        nfm_forward(x2, weights, biases, residual_connections=True))
    ref2 = _reference(x2, weights, biases, residual=True)
    assert out2.shape == (32, hid_dim), out2.shape
    assert jnp.allclose(out2, ref2, atol=1e-5, rtol=1e-5), \
        f"max abs err {jnp.max(jnp.abs(out2 - ref2))}"

    print("KERNEL_OK")
</pallas_src>

<mosaic_0001>
module attributes {stable_mosaic.version = 11 : i64} {
  func.func @_nfm_kernel(%arg0: i32, %arg1: memref<2x128xf32, #tpu.memory_space<vmem>>, %arg2: memref<32x128xf32, #tpu.memory_space<vmem>>, %arg3: memref<1x128xf32, #tpu.memory_space<vmem>>, %arg4: memref<128x128xf32, #tpu.memory_space<vmem>>, %arg5: memref<1x128xf32, #tpu.memory_space<vmem>>, %arg6: memref<2x16xf32, #tpu.memory_space<vmem>>) attributes {dimension_semantics = [#tpu.dimension_semantics<parallel>], iteration_bounds = array<i64: 1>, scalar_prefetch = 0 : i64, scratch_operands = 0 : i64, tpu.core_type = #tpu.core_type<tc>, window_params = [{transform_indices = @transform_0, window_bounds = array<i64: 2, 128>}, {pipeline_mode = #tpu.pipeline_mode<synchronous>, transform_indices = @transform_1, window_bounds = array<i64: 32, 128>}, {pipeline_mode = #tpu.pipeline_mode<synchronous>, transform_indices = @transform_2, window_bounds = array<i64: 1, 128>}, {pipeline_mode = #tpu.pipeline_mode<synchronous>, transform_indices = @transform_3, window_bounds = array<i64: 128, 128>}, {pipeline_mode = #tpu.pipeline_mode<synchronous>, transform_indices = @transform_4, window_bounds = array<i64: 1, 128>}, {transform_indices = @transform_5, window_bounds = array<i64: 2, 16>}]} {
    %c0 = arith.constant 0 : index
    %c0_0 = arith.constant 0 : index
    %0 = vector.load %arg1[%c0, %c0_0] : memref<2x128xf32, #tpu.memory_space<vmem>>, vector<2x128xf32>
    %cst = arith.constant 0.000000e+00 : f32
    %1 = vector.broadcast %cst : f32 to vector<2x32xf32>
    %cst_1 = arith.constant 0.000000e+00 : f32
    %2 = vector.broadcast %cst_1 : f32 to vector<2x32xf32>
    %3 = vector.extract_strided_slice %0 {offsets = [0, 0], sizes = [2, 32], strides = [1, 1]} : vector<2x128xf32> to vector<2x32xf32>
    %4 = arith.addf %1, %3 : vector<2x32xf32>
    %5 = arith.mulf %3, %3 : vector<2x32xf32>
    %6 = arith.addf %2, %5 : vector<2x32xf32>
    %7 = vector.extract_strided_slice %0 {offsets = [0, 32], sizes = [2, 32], strides = [1, 1]} : vector<2x128xf32> to vector<2x32xf32>
    %8 = arith.addf %4, %7 : vector<2x32xf32>
    %9 = arith.mulf %7, %7 : vector<2x32xf32>
    %10 = arith.addf %6, %9 : vector<2x32xf32>
    %11 = vector.extract_strided_slice %0 {offsets = [0, 64], sizes = [2, 32], strides = [1, 1]} : vector<2x128xf32> to vector<2x32xf32>
    %12 = arith.addf %8, %11 : vector<2x32xf32>
    %13 = arith.mulf %11, %11 : vector<2x32xf32>
    %14 = arith.addf %10, %13 : vector<2x32xf32>
    %15 = vector.extract_strided_slice %0 {offsets = [0, 96], sizes = [2, 32], strides = [1, 1]} : vector<2x128xf32> to vector<2x32xf32>
    %16 = arith.addf %12, %15 : vector<2x32xf32>
    %17 = arith.mulf %15, %15 : vector<2x32xf32>
    %18 = arith.addf %14, %17 : vector<2x32xf32>
    %19 = arith.mulf %16, %16 : vector<2x32xf32>
    %20 = arith.subf %19, %18 : vector<2x32xf32>
    %cst_2 = arith.constant 5.000000e-01 : f32
    %21 = vector.broadcast %cst_2 : f32 to vector<2x32xf32>
    %22 = arith.mulf %21, %20 : vector<2x32xf32>
    %c0_3 = arith.constant 0 : index
    %c0_4 = arith.constant 0 : index
    %23 = vector.load %arg2[%c0_3, %c0_4] : memref<32x128xf32, #tpu.memory_space<vmem>>, vector<32x128xf32>
    %c0_5 = arith.constant 0 : index
    %c0_6 = arith.constant 0 : index
    %24 = vector.load %arg3[%c0_5, %c0_6] : memref<1x128xf32, #tpu.memory_space<vmem>>, vector<1x128xf32>
    %cst_7 = arith.constant dense<0.000000e+00> : vector<2x128xf32>
    %25 = tpu.matmul %22, %23, %cst_7 {dimension_numbers = #tpu.dot_dimension_numbers<[1], [0], [0], [1], [0, 0, 1, 1], [], []>} : vector<2x32xf32>, vector<32x128xf32>, vector<2x128xf32> -> vector<2x128xf32>
    %26 = vector.broadcast %24 : vector<1x128xf32> to vector<2x128xf32>
    %27 = arith.addf %25, %26 : vector<2x128xf32>
    %cst_8 = arith.constant 0.000000e+00 : f32
    %28 = vector.broadcast %cst_8 : f32 to vector<2x128xf32>
    %29 = arith.maximumf %27, %28 : vector<2x128xf32>
    %c0_9 = arith.constant 0 : index
    %c0_10 = arith.constant 0 : index
    %30 = vector.load %arg4[%c0_9, %c0_10] : memref<128x128xf32, #tpu.memory_space<vmem>>, vector<128x128xf32>
    %c0_11 = arith.constant 0 : index
    %c0_12 = arith.constant 0 : index
    %31 = vector.load %arg5[%c0_11, %c0_12] : memref<1x128xf32, #tpu.memory_space<vmem>>, vector<1x128xf32>
    %cst_13 = arith.constant dense<0.000000e+00> : vector<2x128xf32>
    %32 = tpu.matmul %29, %30, %cst_13 {dimension_numbers = #tpu.dot_dimension_numbers<[1], [0], [0], [1], [0, 0, 1, 1], [], []>} : vector<2x128xf32>, vector<128x128xf32>, vector<2x128xf32> -> vector<2x128xf32>
    %33 = vector.broadcast %31 : vector<1x128xf32> to vector<2x128xf32>
    %34 = arith.addf %32, %33 : vector<2x128xf32>
    %cst_14 = arith.constant 0.000000e+00 : f32
    %35 = vector.broadcast %cst_14 : f32 to vector<2x128xf32>
    %36 = arith.maximumf %34, %35 : vector<2x128xf32>
    %37 = arith.addf %29, %36 : vector<2x128xf32>
    %38 = vector.extract_strided_slice %37 {offsets = [0, 0], sizes = [2, 16], strides = [1, 1]} : vector<2x128xf32> to vector<2x16xf32>
    %c0_15 = arith.constant 0 : index
    %c0_16 = arith.constant 0 : index
    %39 = vector.load %arg6[%c0_15, %c0_16] : memref<2x16xf32, #tpu.memory_space<vmem>>, vector<2x16xf32>
    tpu.vector_store %arg6[%c0_15, %c0_16], %38 {strides = array<i32>} : memref<2x16xf32, #tpu.memory_space<vmem>>, vector<2x16xf32>,
    return
  }
  func.func @transform_0(%arg0: i32) -> (i32, i32) {
    %c0_i32 = arith.constant 0 : i32
    %c0_i32_0 = arith.constant 0 : i32
    return %arg0, %c0_i32 : i32, i32
  }
  func.func @transform_1(%arg0: i32) -> (i32, i32) {
    %c0_i32 = arith.constant 0 : i32
    %c0_i32_0 = arith.constant 0 : i32
    %c0_i32_1 = arith.constant 0 : i32
    return %c0_i32, %c0_i32_0 : i32, i32
  }
  func.func @transform_2(%arg0: i32) -> (i32, i32) {
    %c0_i32 = arith.constant 0 : i32
    %c0_i32_0 = arith.constant 0 : i32
    %c0_i32_1 = arith.constant 0 : i32
    return %c0_i32, %c0_i32_0 : i32, i32
  }
  func.func @transform_3(%arg0: i32) -> (i32, i32) {
    %c0_i32 = arith.constant 0 : i32
    %c0_i32_0 = arith.constant 0 : i32
    %c0_i32_1 = arith.constant 0 : i32
    return %c0_i32, %c0_i32_0 : i32, i32
  }
  func.func @transform_4(%arg0: i32) -> (i32, i32) {
    %c0_i32 = arith.constant 0 : i32
    %c0_i32_0 = arith.constant 0 : i32
    %c0_i32_1 = arith.constant 0 : i32
    return %c0_i32, %c0_i32_0 : i32, i32
  }
  func.func @transform_5(%arg0: i32) -> (i32, i32) {
    %c0_i32 = arith.constant 0 : i32
    %c0_i32_0 = arith.constant 0 : i32
    return %arg0, %c0_i32 : i32, i32
  }
}

</mosaic_0001>

<bundles_post_ra>
// kernel: tpu_custom_call.1
= control target key start
LH: loop header
LB: loop body
LE: loop exit
PB: predicated region body
PF: predicated region fallthrough
CT: control target
= control target key end

     0   :  { %10 = vsyncpa [#allocation3], 0  ;;  %s555_s0 = inlined_call_operand.hbm [shape: f32[2,128], index: 0, kind: input, shape index: {}]   ;;  %s556_s1 = inlined_call_operand.hbm [shape: f32[32,128], index: 1, kind: input, shape index: {}]   ;;  %s557_s2 = inlined_call_operand.vmem [shape: f32[1,128], index: 2, kind: input, shape index: {}]   ;;  %s558_s3 = inlined_call_operand.hbm [shape: f32[128,128], index: 3, kind: input, shape index: {}]   ;;  %s559_s4 = inlined_call_operand.vmem [shape: f32[1,128], index: 4, kind: input, shape index: {}]   ;;  %s560_s5 = inlined_call_operand.hbm [shape: f32[2,16], index: 5, kind: output, shape index: {}]  }
   0x1   :  { %11 = vsyncpa [#allocation6], 0 }
   0x2   :  { %12 = vsyncpa [#allocation4], 0  ;;  %s460_s18 = smov [#allocation5]  }
   0x3   :  { %s28_s19 = sshll.u32 %s460_s18, 4  ;;  %s29_s19 = int_to_ptr.vmem [resolvable:$true] %s28_s19 }
   0x4   :  { %s382_s20 = scalar_lea.vmem %s29_s19, 512  ;;  %p387_p1 = scmp.lt.s32.totalorder %s29_s19, %s29_s19 }
   0x5   :  { %p383_p0 = scmp.ne.s32.totalorder %s29_s19, %s382_s20  ;;  %p388_p2 = scmp.lt.s32.totalorder %s382_s20, %s382_s20 }
   0x7   :  { %p389_p3 = por %p388_p2, %p387_p1 }
   0x9   :  { %p390_p4 = pnand %p389_p3, %p383_p0 }
   0xb   :  { %393 = shalt.err (!%p390_p4)
}
   0xc   :  { %s461_s21 = smov 128   ;;  %s462_s22 = smov 8  }
   0xd   :  { %34 = dma.hbm_to_vmem [thread:$0]  %s556_s1, 512, %s29_s19, [#allocation6], %s461_s21, %s461_s21, %s462_s22  }
   0xe   :  { %s463_s25 = smov [#allocation2]   ;;  %s464_s27 = smov [#allocation7]  }
   0xf   :  { %s19_s26 = sshll.u32 %s463_s25, 4  ;;  %s42_s28 = sshll.u32 %s464_s27, 4  ;;  %s20_s26 = int_to_ptr.vmem [resolvable:$true] %s19_s26  ;;  %s43_s28 = int_to_ptr.vmem [resolvable:$true] %s42_s28 }
  0x10   :  { %s402_s29 = scalar_lea.vmem %s20_s26, 32  ;;  %p407_p6 = scmp.lt.s32.totalorder %s20_s26, %s20_s26 }
  0x11   :  { %p403_p5 = scmp.ne.s32.totalorder %s20_s26, %s402_s29  ;;  %p408_p7 = scmp.lt.s32.totalorder %s402_s29, %s402_s29 }
  0x13   :  { %p409_p8 = por %p408_p7, %p407_p6 }
  0x15   :  { %p410_p9 = pnand %p409_p8, %p403_p5 }
  0x17   :  { %413 = shalt.err (!%p410_p9)
}
  0x18   :  { %22 = dma.hbm_to_vmem [thread:$0]  %s555_s0, 32, %s20_s26, [#allocation3]  }
  0x19   :  { %s422_s7 = scalar_lea.vmem %s43_s28, 2048  ;;  %p427_p11 = scmp.lt.s32.totalorder %s43_s28, %s43_s28 }
  0x1a   :  { %p423_p10 = scmp.ne.s32.totalorder %s43_s28, %s422_s7  ;;  %p428_p12 = scmp.lt.s32.totalorder %s422_s7, %s422_s7 }
  0x1c   :  { %p429_p13 = por %p428_p12, %p427_p11 }
  0x1e   :  { %p430_p0 = pnand %p429_p13, %p423_p10 }
  0x20   :  { %433 = shalt.err (!%p430_p0)
}
  0x21   :  { %48 = dma.hbm_to_vmem [thread:$0]  %s558_s3, 2048, %s43_s28, [#allocation6], %s461_s21, %s461_s21, %s462_s22  }
  0x22   :  { %454 = dma.done.wait [#allocation3], 32  }
  0x23   :  { %455 = vsyncadd [#allocation3], 4294967264 }
  0x24   :  { %456 = dma.done.wait [#allocation6], 2560  }
  0x25   :  { %457 = vsyncadd [#allocation6], 4294964736  ;;  %v465_v0 = vmov 0.0   ;;  %v512_v1 = vld [vmem:[#allocation2] sm:$0x3]  ;;  %s466_s0 = smov 64  }
  0x26   :  { %317 = vmatprep.subr.mxu0 %v465_v0  ;;  %328 = vmatprep.subr.mxu1 %v465_v0  ;;  %v96_v2 = vld [vmem:[#allocation5 + $0x18] sm:$0xff]  ;;  %s467_s9 = smov 96   ;;  %v518_v3 = vmul.f32 %v512_v1, %v512_v1  ;;  %v95_v4 = vld [vmem:[#allocation5 + $0x10] sm:$0xff]  ;;  %vm468_vm0 = vmmov 0   ;;  %v94_v5 = vld [vmem:[#allocation5 + $0x8] sm:$0xff]  ;;  %s469_s3 = smov 32  }
  0x27   :  { %74 = vrot.lane.b32.xlu1 %v512_v1, %s466_s0  ;;  %65 = vrot.lane.b32.xlu0 %v512_v1, %s467_s9  ;;  %v194_v6 = vld [vmem:[#allocation7 + $0x78] sm:$0xff]  ;;  %v193_v7 = vld [vmem:[#allocation7 + $0x70] sm:$0xff]  ;;  %v93_v8 = vld [vmem:[#allocation5] sm:$0xff]  ;;  %vm104_vm1 = vcmask 261120   ;;  %s470_s14 = smov [#allocation8]   ;;  %vm274_vm2 = vcmask 123904  }
  0x28   :  { %318 = vmatpush3.msra.mxu0 %v96_v2  ;;  %325 = vmatprep.mubr.msk.f32.mxu0 %vm468_vm0, %v465_v0  ;;  %v192_v9 = vld [vmem:[#allocation7 + $0x68] sm:$0xff]  ;;  %v191_v10 = vld [vmem:[#allocation7 + $0x60] sm:$0xff]  ;;  %v190_v11 = vld [vmem:[#allocation7 + $0x58] sm:$0xff]  ;;  %s282_s15 = sshll.u32 %s470_s14, 4  ;;  %s283_s15 = int_to_ptr.vmem [resolvable:$true] %s282_s15 }
  0x29   :  { %319 = vmatprep.subr.mxu0 %v465_v0  ;;  %360 = vmatprep.mubr.msk.f32.mxu1 %vm468_vm0, %v465_v0  ;;  %v189_v12 = vld [vmem:[#allocation7 + $0x50] sm:$0xff]  ;;  %v188_v13 = vld [vmem:[#allocation7 + $0x48] sm:$0xff]  ;;  %v187_v14 = vld [vmem:[#allocation7 + $0x40] sm:$0xff]  ;;  %p439_p2 = scmp.lt.s32.totalorder %s283_s15, %s283_s15 }
  0x2a   :  { %320 = vmatpush3.msra.mxu0 %v95_v4  ;;  %329 = vmatpush3.msra.mxu1 %v194_v6  ;;  %v186_v15 = vld [vmem:[#allocation7 + $0x38] sm:$0xff]  ;;  %v185_v16 = vld [vmem:[#allocation7 + $0x30] sm:$0xff]  ;;  %v184_v17 = vld [vmem:[#allocation7 + $0x28] sm:$0xff] }
  0x2b   :  { %78 = vrot.lane.b32.xlu1 %v518_v3, %s466_s0  ;;  %70 = vrot.lane.b32.xlu0 %v518_v3, %s467_s9  ;;  %v183_v18 = vld [vmem:[#allocation7 + $0x20] sm:$0xff]  ;;  %v182_v19 = vld [vmem:[#allocation7 + $0x18] sm:$0xff]  ;;  %v181_v35 = vld [vmem:[#allocation7 + $0x10] sm:$0xff] }
  0x2c   :  { %321 = vmatprep.subr.mxu0 %v465_v0  ;;  %330 = vmatprep.subr.mxu1 %v465_v0  ;;  %v180_v36 = vld [vmem:[#allocation7 + $0x8] sm:$0xff]  ;;  %v179_v37 = vld [vmem:[#allocation7] sm:$0xff]  ;;  %v292_v38 = vld [vmem:[%s557_s2] ss:$0 sm:$0xff]  ;;  %s434_s2 = scalar_lea.vmem %s283_s15, 32 }
  0x2d   :  { %322 = vmatpush3.msra.mxu0 %v94_v5  ;;  %331 = vmatpush3.msra.mxu1 %v193_v7  ;;  %v294_v43 = vld [vmem:[%s559_s4] ss:$0 sm:$0xff]  ;;  %p435_p1 = scmp.ne.s32.totalorder %s283_s15, %s434_s2  ;;  %p440_p3 = scmp.lt.s32.totalorder %s434_s2, %s434_s2 }
  0x2e   :  { %323 = vmatprep.subr.mxu0 %v465_v0  ;;  %332 = vmatprep.subr.mxu1 %v465_v0 }
  0x2f   :  { %86 = vrot.lane.b32.xlu1 %v518_v3, %s469_s3  ;;  %82 = vrot.lane.b32.xlu0 %v512_v1, %s469_s3  ;;  %p441_p4 = por %p440_p3, %p439_p2 }
  0x30   :  { %324 = vmatpush3.msra.mxu0 %v93_v8  ;;  %333 = vmatpush3.msra.mxu1 %v192_v9 }
  0x31   :  { %334 = vmatprep.subr.mxu1 %v465_v0  ;;  %p442_p5 = pnand %p441_p4, %p435_p1 }
  0x32   :  { %335 = vmatpush3.msra.mxu1 %v191_v10 }
  0x33   :  { %336 = vmatprep.subr.mxu1 %v465_v0 }
  0x34   :  { %337 = vmatpush3.msra.mxu1 %v190_v11 }
  0x35   :  { %338 = vmatprep.subr.mxu1 %v465_v0 }
  0x36   :  { %339 = vmatpush3.msra.mxu1 %v189_v12 }
  0x37   :  { %340 = vmatprep.subr.mxu1 %v465_v0 }
  0x38   :  { %341 = vmatpush3.msra.mxu1 %v188_v13 }
  0x39   :  { %342 = vmatprep.subr.mxu1 %v465_v0 }
  0x3a   :  { %343 = vmatpush3.msra.mxu1 %v187_v14 }
  0x3b   :  { %344 = vmatprep.subr.mxu1 %v465_v0 }
  0x3c   :  { %345 = vmatpush3.msra.mxu1 %v186_v15 }
  0x3d   :  { %346 = vmatprep.subr.mxu1 %v465_v0 }
  0x3e   :  { %347 = vmatpush3.msra.mxu1 %v185_v16 }
  0x3f   :  { %348 = vmatprep.subr.mxu1 %v465_v0 }
  0x40   :  { %349 = vmatpush3.msra.mxu1 %v184_v17 }
  0x41   :  { %350 = vmatprep.subr.mxu1 %v465_v0 }
  0x42   :  { %351 = vmatpush3.msra.mxu1 %v183_v18 }
  0x43   :  { %352 = vmatprep.subr.mxu1 %v465_v0 }
  0x44   :  { %353 = vmatpush3.msra.mxu1 %v182_v19 }
  0x45   :  { %354 = vmatprep.subr.mxu1 %v465_v0 }
  0x46   :  { %355 = vmatpush3.msra.mxu1 %v181_v35 }
  0x47   :  { %356 = vmatprep.subr.mxu1 %v465_v0 }
  0x48   :  { %357 = vmatpush3.msra.mxu1 %v180_v36 }
  0x49   :  { %358 = vmatprep.subr.mxu1 %v465_v0 }
  0x4a   :  { %359 = vmatpush3.msra.mxu1 %v179_v37 }
  0x99   :  { %v75_v20 = vpop.permute.xlu1 %74  ;;  %v66_v21 = vpop.permute.xlu0 %65 }
  0x9a   :  { %v68_v22 = vadd.f32 %v66_v21, %v512_v1 }
  0x9c   :  { %v77_v27 = vadd.f32 %v75_v20, %v68_v22 }
  0x9d   :  { %v79_v23 = vpop.permute.xlu1 %78  ;;  %v71_v24 = vpop.permute.xlu0 %70 }
  0x9e   :  { %v73_v25 = vadd.f32 %v71_v24, %v518_v3 }
  0xa0   :  { %v81_v26 = vadd.f32 %v79_v23, %v73_v25 }
  0xa1   :  { %v87_v28 = vpop.permute.xlu1 %86  ;;  %v83_v29 = vpop.permute.xlu0 %82 }
  0xa2   :  { %v85_v30 = vadd.f32 %v83_v29, %v77_v27  ;;  %v89_v31 = vadd.f32 %v87_v28, %v81_v26 }
  0xa4   :  { %v90_v32 = vmul.f32 %v85_v30, %v85_v30 }
  0xa6   :  { %v91_v33 = vsub.f32 %v90_v32, %v89_v31 }
  0xa8   :  { %v92_v34 = vmul.f32 0.5, %v91_v33 }
  0xaa   :  { %326 = vmatmul.mubr.msk.f32.vlgmr.msra.gmra.mxu0 %vm104_vm1, %v92_v34 }
 0x16a   :  { %v174_v39 = vpop.f32.mrf.mxu0 }
 0x16b   :  { %v175_v40 = vadd.f32 %v292_v38, %v174_v39 }
 0x16c   :  { %v327_v41 = vpop.f32.mrf.mxu0 }
 0x16d   :  { %v178_v42 = vmax.f32 %v175_v40, 0.0 }
 0x16f   :  { %361 = vmatmul.mubr.f32.vlgmr.msra.gmra.mxu1 %v178_v42 }
 0x22f   :  { %v268_v44 = vpop.f32.mrf.mxu1 }
 0x230   :  { %v269_v45 = vadd.f32 %v294_v43, %v268_v44 }
 0x231   :  { %v362_v46 = vpop.f32.mrf.mxu1 }
 0x232   :  { %v272_v47 = vmax.f32 %v269_v45, 0.0 }
 0x234   :  { %v273_v48 = vadd.f32 %v272_v47, %v178_v42 }
 0x236   :  { %275 = vst.msk [vmem:[#allocation8] sm:$0x3] %vm274_vm2, %v273_v48 }
 0x237   :  { %445 = shalt.err (!%p442_p5)
}
 0x238   :  { %285 = dma.vmem_to_hbm [thread:$0]  %s283_s15, 32, %s560_s5, [#allocation4]  }
 0x239   :  { %458 = dma.done.wait [#allocation4], 32  }
 0x23a   :  { %459 = vsyncadd [#allocation4], 4294967264 }
 0x23b   :  { %289 = vsyncpa [#allocation3], 1 }
 0x23c   :  { %290 = vsyncpa [#allocation6], 1 }
 0x23d   :  { %291 = vsyncpa [#allocation4], 1 }

</bundles_post_ra>
